<compile_context>
chip_gen: v6e
topology: v6e:2x2x1
jax: 0.10.0
libtpu: 0.0.40
codegen_flags: <defaults>
</compile_context>

<pallas_src>
import functools

import jax
import jax.numpy as jnp
from jax.experimental import pallas as pl
from jax.experimental.pallas import tpu as pltpu

_BATCH_ALIGN = 16  # covers bf16 (16,128) packing and f32 (8,128) tiles


def _round_up(n: int, m: int) -> int:
    return ((n + m - 1) // m) * m


def _pad_feature(d: int) -> int:
    """Lane-pad a feature dim: 128 minimum, 256 when it costs <= 25% extra padding."""
    p128 = _round_up(d, 128)
    p256 = _round_up(d, 256)
    return p256 if p256 * 4 <= p128 * 5 else p128


def _choose_batch_tiling(batch: int, tb_max: int = 1024):
    """Pick (tile_rows, padded_rows) minimizing wasted rows; prefer >= 2 grid steps."""
    b = _round_up(batch, _BATCH_ALIGN)
    # Cap the tile at ~half the batch so the grid has >= 2 steps when possible
    # (lets v7x's two TensorCores split the "parallel" batch axis).
    cap = min(tb_max, max(_BATCH_ALIGN, _round_up(-(-b // 2), _BATCH_ALIGN)))
    for tb in (1024, 512, 256, 128, 64, 32, 16):
        if tb > cap:
            continue
        padded = _round_up(b, tb)
        if padded - b <= max(b // 8, _BATCH_ALIGN):  # <= ~12.5% wasted rows
            return tb, padded
    return _BATCH_ALIGN, b


def dqn_kernel(x_ref, w1_ref, b1_ref, w2_ref, b2_ref, w3_ref, b3_ref, out_ref):
    cd = w2_ref.dtype  # compute dtype (bf16): MXU inputs + materialized activations
    # Layer 1: Linear(input -> hidden) + ReLU. bf16 MXU matmul, f32 accumulate,
    # f32 bias/ReLU epilogue, then cast back to bf16 so the (tb, hid_p) intermediate
    # that spills to VMEM is half-width. Bias refs are (1, N); VPU add broadcasts the
    # sublane-0 row for free.
    h1 = jnp.dot(x_ref[...], w1_ref[...], preferred_element_type=jnp.float32)
    h1 = jnp.maximum(h1 + b1_ref[...], 0.0).astype(cd)
    # Layer 2: Linear(hidden -> hidden) + ReLU
    h2 = jnp.dot(h1, w2_ref[...], preferred_element_type=jnp.float32)
    h2 = jnp.maximum(h2 + b2_ref[...], 0.0).astype(cd)
    # Q head: Linear(hidden -> output)
    q = jnp.dot(h2, w3_ref[...], preferred_element_type=jnp.float32)
    out_ref[...] = (q + b3_ref[...]).astype(out_ref.dtype)


def prepare_params(params, *, compute_dtype=jnp.bfloat16):
    """One-time cast + lane-pad of the weights/biases (hoisted out of the forward).

    params hold transposed weights [in, out] (PyTorch nn.Linear stores [out, in]).
    Weights are cast to the bf16 MXU dtype; biases stay f32 for the f32 epilogue.
    Zero padding keeps the math exact.
    """
    w1, b1 = params["w1"], params["b1"]
    w2, b2 = params["w2"], params["b2"]
    w3, b3 = params["w3"], params["b3"]

    input_dim, hidden_dim = w1.shape
    output_dim = w3.shape[1]
    in_p, hid_p, out_p = _pad_feature(input_dim), _pad_feature(hidden_dim), _pad_feature(output_dim)

    def pad2(a, rows, cols, dtype):
        a = jnp.asarray(a, dtype).reshape((-1, a.shape[-1]))
        return jnp.pad(a, ((0, rows - a.shape[0]), (0, cols - a.shape[1])))

    return {
        "w1": pad2(w1, in_p, hid_p, compute_dtype),
        "b1": pad2(b1, 1, hid_p, jnp.float32),
        "w2": pad2(w2, hid_p, hid_p, compute_dtype),
        "b2": pad2(b2, 1, hid_p, jnp.float32),
        "w3": pad2(w3, hid_p, out_p, compute_dtype),
        "b3": pad2(b3, 1, out_p, jnp.float32),
    }


def deep_q_net(x, prepped, *, output_dim: int, tb_max: int = 1024,
               out_dtype=jnp.bfloat16):
    """Forward pass. x: [B, input_dim] f32, prepped: output of prepare_params().

    out_dtype defaults to bf16: the matmul path is already bf16 on the MXU, and a bf16
    writeback halves the dominant HBM output stream (pass jnp.float32 to keep f32 Q).
    """
    w1_p, b1_p = prepped["w1"], prepped["b1"]
    w2_p, b2_p = prepped["w2"], prepped["b2"]
    w3_p, b3_p = prepped["w3"], prepped["b3"]

    B, input_dim = x.shape
    in_p, hid_p = w1_p.shape
    out_p = w3_p.shape[1]
    compute_dtype = w1_p.dtype

    tb, b_p = _choose_batch_tiling(B, tb_max)
    x_p = jnp.pad(x.astype(compute_dtype), ((0, b_p - B), (0, in_p - input_dim)))

    grid = (b_p // tb,)
    cbytes = jnp.dtype(compute_dtype).itemsize
    obytes = jnp.dtype(out_dtype).itemsize

    weight_hbm_bytes = ((w1_p.size + w2_p.size + w3_p.size) * cbytes
                        + (b1_p.size + b2_p.size + b3_p.size) * 4)
    flops = 2 * b_p * (in_p * hid_p + hid_p * hid_p + hid_p * out_p)
    bytes_accessed = b_p * in_p * cbytes + weight_hbm_bytes + b_p * out_p * obytes
    cost = pl.CostEstimate(flops=flops, transcendentals=0, bytes_accessed=bytes_accessed)

    # VMEM budget: resident weights/biases (counted x2 — the default pipeline still
    # allocates double buffers for constant-index_map operands), double-buffered x/out
    # tiles, plus the f32+bf16 hidden intermediates. Clamped to 64 MiB (v7x physical).
    vmem_need = (2 * weight_hbm_bytes
                 + 2 * tb * in_p * cbytes
                 + 2 * tb * out_p * obytes
                 + 2 * tb * hid_p * (4 + cbytes))
    vmem_limit = int(min(64 << 20, max(32 << 20, (vmem_need * 3) // 2)))

    # Weights/biases: constant index_map -> fetched once, VMEM-resident across steps.
    const = lambda shape: pl.BlockSpec(shape, lambda i: (0, 0))

    q_pad = pl.pallas_call(
        dqn_kernel,
        out_shape=jax.ShapeDtypeStruct((b_p, out_p), out_dtype),
        grid=grid,
        in_specs=[
            pl.BlockSpec((tb, in_p), lambda i: (i, 0)),   # x: streamed batch tiles
            const(w1_p.shape), const(b1_p.shape),
            const(w2_p.shape), const(b2_p.shape),
            const(w3_p.shape), const(b3_p.shape),
        ],
        out_specs=pl.BlockSpec((tb, out_p), lambda i: (i, 0)),
        compiler_params=pltpu.CompilerParams(
            # Batch tiles are independent: shard across both TCs on v7x.
            dimension_semantics=("parallel",),
            vmem_limit_bytes=vmem_limit,
        ),
        cost_estimate=cost,
    )(x_p, w1_p, b1_p, w2_p, b2_p, w3_p, b3_p)

    # Slice away batch padding and the lane-padded Q columns.
    return q_pad[:B, :output_dim]


def init_params(key, input_dim, output_dim, hidden_dim):
    """Deterministic init matching the PyTorch module's parameter shapes.

    PyTorch nn.Linear stores weight as [out, in]; we keep the transposed [in, out]
    form so the kernel does x @ W + b directly.
    """
    ks = jax.random.split(key, 6)

    def lin(kw, kb, fan_in, fan_out):
        bound = 1.0 / jnp.sqrt(fan_in)
        w = jax.random.uniform(kw, (fan_in, fan_out), jnp.float32, -bound, bound)
        b = jax.random.uniform(kb, (1, fan_out), jnp.float32, -bound, bound)
        return w, b

    w1, b1 = lin(ks[0], ks[1], input_dim, hidden_dim)
    w2, b2 = lin(ks[2], ks[3], hidden_dim, hidden_dim)
    w3, b3 = lin(ks[4], ks[5], hidden_dim, output_dim)
    return {"w1": w1, "b1": b1, "w2": w2, "b2": b2, "w3": w3, "b3": b3}


def reference_forward(x, params, compute_dtype=jnp.bfloat16):
    """Pure-JAX reference mirroring the kernel's precision (bf16 MXU, f32 accumulate)."""
    cd = compute_dtype
    h1 = jnp.dot(x.astype(cd), params["w1"].astype(cd),
                 preferred_element_type=jnp.float32) + params["b1"]
    h1 = jnp.maximum(h1, 0.0)
    h2 = jnp.dot(h1.astype(cd), params["w2"].astype(cd),
                 preferred_element_type=jnp.float32) + params["b2"]
    h2 = jnp.maximum(h2, 0.0)
    return jnp.dot(h2.astype(cd), params["w3"].astype(cd),
                   preferred_element_type=jnp.float32) + params["b3"]


if __name__ == "__main__":
    key = jax.random.PRNGKey(0)
    k_param, k_x1, k_x2 = jax.random.split(key, 3)

    input_dim, hidden_dim, output_dim = 16, 32, 4
    params = init_params(k_param, input_dim, output_dim, hidden_dim)
    prepped = prepare_params(params)  # one-time cast/pad, outside the jitted forward

    dqn = jax.jit(functools.partial(deep_q_net, output_dim=output_dim))

    # Case 1: small batch -> single tile.
    x1 = jax.random.normal(k_x1, (8, input_dim), jnp.float32)
    q1 = jax.block_until_ready(dqn(x1, prepped))
    # Case 2: batch not a tile multiple -> multi-step grid, resident weights reused
    # across steps, padded rows sliced off.
    x2 = jax.random.normal(k_x2, (20, input_dim), jnp.float32)
    q2 = jax.block_until_ready(dqn(x2, prepped))

    for x, q, b in ((x1, q1, 8), (x2, q2, 20)):
        q_ref = reference_forward(x, params)
        assert q.shape == (b, output_dim), q.shape
        q_f32 = q.astype(jnp.float32)
        err = jnp.max(jnp.abs(q_f32 - q_ref))
        assert jnp.allclose(q_f32, q_ref, atol=3e-2, rtol=3e-2), f"max abs err = {err}"

    print("KERNEL_OK")
</pallas_src>

<mosaic_0001>
module attributes {stable_mosaic.version = 11 : i64} {
  func.func @dqn_kernel(%arg0: i32, %arg1: memref<16x128xbf16, #tpu.memory_space<vmem>>, %arg2: memref<128x128xbf16, #tpu.memory_space<vmem>>, %arg3: memref<1x128xf32, #tpu.memory_space<vmem>>, %arg4: memref<128x128xbf16, #tpu.memory_space<vmem>>, %arg5: memref<1x128xf32, #tpu.memory_space<vmem>>, %arg6: memref<128x128xbf16, #tpu.memory_space<vmem>>, %arg7: memref<1x128xf32, #tpu.memory_space<vmem>>, %arg8: memref<16x128xbf16, #tpu.memory_space<vmem>>) attributes {dimension_semantics = [#tpu.dimension_semantics<parallel>], iteration_bounds = array<i64: 1>, scalar_prefetch = 0 : i64, scratch_operands = 0 : i64, tpu.core_type = #tpu.core_type<tc>, window_params = [{transform_indices = @transform_0, window_bounds = array<i64: 16, 128>}, {pipeline_mode = #tpu.pipeline_mode<synchronous>, transform_indices = @transform_1, window_bounds = array<i64: 128, 128>}, {pipeline_mode = #tpu.pipeline_mode<synchronous>, transform_indices = @transform_2, window_bounds = array<i64: 1, 128>}, {pipeline_mode = #tpu.pipeline_mode<synchronous>, transform_indices = @transform_3, window_bounds = array<i64: 128, 128>}, {pipeline_mode = #tpu.pipeline_mode<synchronous>, transform_indices = @transform_4, window_bounds = array<i64: 1, 128>}, {pipeline_mode = #tpu.pipeline_mode<synchronous>, transform_indices = @transform_5, window_bounds = array<i64: 128, 128>}, {pipeline_mode = #tpu.pipeline_mode<synchronous>, transform_indices = @transform_6, window_bounds = array<i64: 1, 128>}, {transform_indices = @transform_7, window_bounds = array<i64: 16, 128>}]} {
    %c0 = arith.constant 0 : index
    %c0_0 = arith.constant 0 : index
    %0 = vector.load %arg1[%c0, %c0_0] : memref<16x128xbf16, #tpu.memory_space<vmem>>, vector<16x128xbf16>
    %c0_1 = arith.constant 0 : index
    %c0_2 = arith.constant 0 : index
    %1 = vector.load %arg2[%c0_1, %c0_2] : memref<128x128xbf16, #tpu.memory_space<vmem>>, vector<128x128xbf16>
    %cst = arith.constant dense<0.000000e+00> : vector<16x128xf32>
    %2 = tpu.matmul %0, %1, %cst {dimension_numbers = #tpu.dot_dimension_numbers<[1], [0], [0], [1], [0, 0, 1, 1], [], []>} : vector<16x128xbf16>, vector<128x128xbf16>, vector<16x128xf32> -> vector<16x128xf32>
    %c0_3 = arith.constant 0 : index
    %c0_4 = arith.constant 0 : index
    %3 = vector.load %arg3[%c0_3, %c0_4] : memref<1x128xf32, #tpu.memory_space<vmem>>, vector<1x128xf32>
    %4 = vector.broadcast %3 : vector<1x128xf32> to vector<16x128xf32>
    %5 = arith.addf %2, %4 : vector<16x128xf32>
    %cst_5 = arith.constant 0.000000e+00 : f32
    %6 = vector.broadcast %cst_5 : f32 to vector<16x128xf32>
    %7 = arith.maximumf %5, %6 : vector<16x128xf32>
    %8 = arith.truncf %7 : vector<16x128xf32> to vector<16x128xbf16>
    %c0_6 = arith.constant 0 : index
    %c0_7 = arith.constant 0 : index
    %9 = vector.load %arg4[%c0_6, %c0_7] : memref<128x128xbf16, #tpu.memory_space<vmem>>, vector<128x128xbf16>
    %cst_8 = arith.constant dense<0.000000e+00> : vector<16x128xf32>
    %10 = tpu.matmul %8, %9, %cst_8 {dimension_numbers = #tpu.dot_dimension_numbers<[1], [0], [0], [1], [0, 0, 1, 1], [], []>} : vector<16x128xbf16>, vector<128x128xbf16>, vector<16x128xf32> -> vector<16x128xf32>
    %c0_9 = arith.constant 0 : index
    %c0_10 = arith.constant 0 : index
    %11 = vector.load %arg5[%c0_9, %c0_10] : memref<1x128xf32, #tpu.memory_space<vmem>>, vector<1x128xf32>
    %12 = vector.broadcast %11 : vector<1x128xf32> to vector<16x128xf32>
    %13 = arith.addf %10, %12 : vector<16x128xf32>
    %cst_11 = arith.constant 0.000000e+00 : f32
    %14 = vector.broadcast %cst_11 : f32 to vector<16x128xf32>
    %15 = arith.maximumf %13, %14 : vector<16x128xf32>
    %16 = arith.truncf %15 : vector<16x128xf32> to vector<16x128xbf16>
    %c0_12 = arith.constant 0 : index
    %c0_13 = arith.constant 0 : index
    %17 = vector.load %arg6[%c0_12, %c0_13] : memref<128x128xbf16, #tpu.memory_space<vmem>>, vector<128x128xbf16>
    %cst_14 = arith.constant dense<0.000000e+00> : vector<16x128xf32>
    %18 = tpu.matmul %16, %17, %cst_14 {dimension_numbers = #tpu.dot_dimension_numbers<[1], [0], [0], [1], [0, 0, 1, 1], [], []>} : vector<16x128xbf16>, vector<128x128xbf16>, vector<16x128xf32> -> vector<16x128xf32>
    %c0_15 = arith.constant 0 : index
    %c0_16 = arith.constant 0 : index
    %19 = vector.load %arg7[%c0_15, %c0_16] : memref<1x128xf32, #tpu.memory_space<vmem>>, vector<1x128xf32>
    %20 = vector.broadcast %19 : vector<1x128xf32> to vector<16x128xf32>
    %21 = arith.addf %18, %20 : vector<16x128xf32>
    %22 = arith.truncf %21 : vector<16x128xf32> to vector<16x128xbf16>
    %c0_17 = arith.constant 0 : index
    %c0_18 = arith.constant 0 : index
    %23 = vector.load %arg8[%c0_17, %c0_18] : memref<16x128xbf16, #tpu.memory_space<vmem>>, vector<16x128xbf16>
    tpu.vector_store %arg8[%c0_17, %c0_18], %22 {strides = array<i32>} : memref<16x128xbf16, #tpu.memory_space<vmem>>, vector<16x128xbf16>,
    return
  }
  func.func @transform_0(%arg0: i32) -> (i32, i32) {
    %c0_i32 = arith.constant 0 : i32
    %c0_i32_0 = arith.constant 0 : i32
    return %arg0, %c0_i32 : i32, i32
  }
  func.func @transform_1(%arg0: i32) -> (i32, i32) {
    %c0_i32 = arith.constant 0 : i32
    %c0_i32_0 = arith.constant 0 : i32
    %c0_i32_1 = arith.constant 0 : i32
    return %c0_i32, %c0_i32_0 : i32, i32
  }
  func.func @transform_2(%arg0: i32) -> (i32, i32) {
    %c0_i32 = arith.constant 0 : i32
    %c0_i32_0 = arith.constant 0 : i32
    %c0_i32_1 = arith.constant 0 : i32
    return %c0_i32, %c0_i32_0 : i32, i32
  }
  func.func @transform_3(%arg0: i32) -> (i32, i32) {
    %c0_i32 = arith.constant 0 : i32
    %c0_i32_0 = arith.constant 0 : i32
    %c0_i32_1 = arith.constant 0 : i32
    return %c0_i32, %c0_i32_0 : i32, i32
  }
  func.func @transform_4(%arg0: i32) -> (i32, i32) {
    %c0_i32 = arith.constant 0 : i32
    %c0_i32_0 = arith.constant 0 : i32
    %c0_i32_1 = arith.constant 0 : i32
    return %c0_i32, %c0_i32_0 : i32, i32
  }
  func.func @transform_5(%arg0: i32) -> (i32, i32) {
    %c0_i32 = arith.constant 0 : i32
    %c0_i32_0 = arith.constant 0 : i32
    %c0_i32_1 = arith.constant 0 : i32
    return %c0_i32, %c0_i32_0 : i32, i32
  }
  func.func @transform_6(%arg0: i32) -> (i32, i32) {
    %c0_i32 = arith.constant 0 : i32
    %c0_i32_0 = arith.constant 0 : i32
    %c0_i32_1 = arith.constant 0 : i32
    return %c0_i32, %c0_i32_0 : i32, i32
  }
  func.func @transform_7(%arg0: i32) -> (i32, i32) {
    %c0_i32 = arith.constant 0 : i32
    %c0_i32_0 = arith.constant 0 : i32
    return %arg0, %c0_i32 : i32, i32
  }
}

</mosaic_0001>

<bundles_post_ra>
// kernel: deep_q_net.1
= control target key start
LH: loop header
LB: loop body
LE: loop exit
PB: predicated region body
PF: predicated region fallthrough
CT: control target
= control target key end

     0   :  { %12 = vsyncpa [#allocation3], 0  ;;  %s755_s0 = inlined_call_operand.vmem [shape: bf16[16,128], index: 0, kind: input, shape index: {}]   ;;  %s756_s1 = inlined_call_operand.hbm [shape: bf16[128,128], index: 1, kind: input, shape index: {}]   ;;  %s757_s2 = inlined_call_operand.vmem [shape: f32[1,128], index: 2, kind: input, shape index: {}]   ;;  %s758_s3 = inlined_call_operand.hbm [shape: bf16[128,128], index: 3, kind: input, shape index: {}]   ;;  %s759_s4 = inlined_call_operand.vmem [shape: f32[1,128], index: 4, kind: input, shape index: {}]   ;;  %s760_s5 = inlined_call_operand.hbm [shape: bf16[128,128], index: 5, kind: input, shape index: {}]   ;;  %s761_s6 = inlined_call_operand.vmem [shape: f32[1,128], index: 6, kind: input, shape index: {}]   ;;  %s762_s7 = inlined_call_operand.vmem [shape: bf16[16,128], index: 7, kind: output, shape index: {}]  }
   0x1   :  { %13 = vsyncpa [#allocation5], 0  ;;  %s654_s24 = smov [#allocation4]   ;;  %s655_s26 = smov [#allocation2]  }
   0x2   :  { %s35_s25 = sshll.u32 %s654_s24, 4  ;;  %s21_s27 = sshll.u32 %s655_s26, 4  ;;  %s36_s25 = int_to_ptr.vmem [resolvable:$true] %s35_s25  ;;  %s22_s27 = int_to_ptr.vmem [resolvable:$true] %s21_s27 }
   0x3   :  { %s598_s28 = scalar_lea.vmem %s36_s25, 1024  ;;  %p603_p1 = scmp.lt.s32.totalorder %s36_s25, %s36_s25 }
   0x4   :  { %p599_p0 = scmp.ne.s32.totalorder %s36_s25, %s598_s28  ;;  %p604_p2 = scmp.lt.s32.totalorder %s598_s28, %s598_s28 }
   0x6   :  { %p605_p3 = por %p604_p2, %p603_p1 }
   0x8   :  { %p606_p4 = pnand %p605_p3, %p599_p0 }
   0xa   :  { %609 = shalt.err (!%p606_p4)
}
   0xb   :  { %s656_s29 = smov 64   ;;  %s657_s30 = smov 4  }
   0xc   :  { %41 = dma.hbm_to_vmem [thread:$0]  %s758_s3, 1024, %s36_s25, [#allocation5], %s656_s29, %s656_s29, %s657_s30  }
   0xd   :  { %s618_s10 = scalar_lea.vmem %s22_s27, 1024  ;;  %p623_p6 = scmp.lt.s32.totalorder %s22_s27, %s22_s27 }
   0xe   :  { %p619_p5 = scmp.ne.s32.totalorder %s22_s27, %s618_s10  ;;  %p624_p7 = scmp.lt.s32.totalorder %s618_s10, %s618_s10 }
  0x10   :  { %p625_p8 = por %p624_p7, %p623_p6 }
  0x12   :  { %p626_p9 = pnand %p625_p8, %p619_p5 }
  0x14   :  { %629 = shalt.err (!%p626_p9)
}
  0x15   :  { %27 = dma.hbm_to_vmem [thread:$0]  %s756_s1, 1024, %s22_s27, [#allocation3], %s656_s29, %s656_s29, %s657_s30  }
  0x16   :  { %s658_s13 = smov [#allocation6]  }
  0x17   :  { %s49_s14 = sshll.u32 %s658_s13, 4  ;;  %s50_s14 = int_to_ptr.vmem [resolvable:$true] %s49_s14 }
  0x18   :  { %s638_s15 = scalar_lea.vmem %s50_s14, 1024  ;;  %p643_p11 = scmp.lt.s32.totalorder %s50_s14, %s50_s14 }
  0x19   :  { %p639_p10 = scmp.ne.s32.totalorder %s50_s14, %s638_s15  ;;  %p644_p12 = scmp.lt.s32.totalorder %s638_s15, %s638_s15 }
  0x1b   :  { %p645_p13 = por %p644_p12, %p643_p11 }
  0x1d   :  { %p646_p0 = pnand %p645_p13, %p639_p10 }
  0x1f   :  { %649 = shalt.err (!%p646_p0)
}
  0x20   :  { %55 = dma.hbm_to_vmem [thread:$0]  %s760_s5, 1024, %s50_s14, [#allocation5], %s656_s29, %s656_s29, %s657_s30  }
  0x21   :  { %650 = dma.done.wait [#allocation3], 1024  }
  0x22   :  { %651 = vsyncadd [#allocation3], 4294966272 }
  0x23   :  { %652 = dma.done.wait [#allocation5], 2048  }
  0x24   :  { %653 = vsyncadd [#allocation5], 4294965248  ;;  %v659_v0 = vmov 0.0   ;;  %vm660_vm0 = vmmov 0   ;;  %v565_v1 = vld [vmem:[#allocation2 + $0x38] sm:$0xff]   ;;  %v566_v2 = vld [vmem:[#allocation2 + $0x30] sm:$0xff]  }
  0x25   :  { %498 = vmatprep.subr.bf16.mxu0 %v659_v0  ;;  %514 = vmatprep.mubr.msk.bf16.mxu0 %vm660_vm0, %v659_v0  ;;  %v567_v3 = vld [vmem:[#allocation2 + $0x28] sm:$0xff]   ;;  %v574_v4 = vld [vmem:[#allocation4 + $0x38] sm:$0xff]   ;;  %v568_v5 = vld [vmem:[#allocation2 + $0x20] sm:$0xff]  }
  0x26   :  { %518 = vmatprep.subr.bf16.mxu1 %v659_v0  ;;  %534 = vmatprep.mubr.msk.bf16.mxu1 %vm660_vm0, %v659_v0  ;;  %v575_v6 = vld [vmem:[#allocation4 + $0x30] sm:$0xff]   ;;  %v569_v7 = vld [vmem:[#allocation2 + $0x18] sm:$0xff]   ;;  %v576_v8 = vld [vmem:[#allocation4 + $0x28] sm:$0xff]  }
  0x27   :  { %499 = vmatpush3.bf16.msra.mxu0 %v565_v1  ;;  %519 = vmatpush3.bf16.msra.mxu1 %v574_v4  ;;  %v570_v9 = vld [vmem:[#allocation2 + $0x10] sm:$0xff]   ;;  %v577_v10 = vld [vmem:[#allocation4 + $0x20] sm:$0xff]   ;;  %v571_v11 = vld [vmem:[#allocation2 + $0x8] sm:$0xff]  }
  0x28   :  { %500 = vmatprep.subr.bf16.mxu0 %v659_v0  ;;  %520 = vmatprep.subr.bf16.mxu1 %v659_v0  ;;  %v578_v12 = vld [vmem:[#allocation4 + $0x18] sm:$0xff]   ;;  %v572_v13 = vld [vmem:[#allocation2] sm:$0xff]   ;;  %v579_v15 = vld [vmem:[#allocation4 + $0x10] sm:$0xff]  }
  0x29   :  { %v573_v14 = vld [vmem:[%s755_s0] sm:$0xff]   ;;  %v580_v16 = vld [vmem:[#allocation4 + $0x8] sm:$0xff]   ;;  %v582_v18 = vld [vmem:[#allocation6 + $0x38] sm:$0xff]  }
  0x2a   :  { %v581_v17 = vld [vmem:[#allocation4] sm:$0xff]   ;;  %v583_v19 = vld [vmem:[#allocation6 + $0x30] sm:$0xff]   ;;  %v584_v20 = vld [vmem:[#allocation6 + $0x28] sm:$0xff]  }
  0x2b   :  { %501 = vmatpush3.bf16.msra.mxu0 %v566_v2  ;;  %521 = vmatpush3.bf16.msra.mxu1 %v575_v6  ;;  %v585_v21 = vld [vmem:[#allocation6 + $0x20] sm:$0xff]   ;;  %v586_v22 = vld [vmem:[#allocation6 + $0x18] sm:$0xff]   ;;  %v587_v33 = vld [vmem:[#allocation6 + $0x10] sm:$0xff]  }
  0x2c   :  { %502 = vmatprep.subr.bf16.mxu0 %v659_v0  ;;  %522 = vmatprep.subr.bf16.mxu1 %v659_v0  ;;  %v434_v23 = vld [vmem:[%s757_s2] ss:$0 sm:$0xff]  ;;  %v588_v34 = vld [vmem:[#allocation6 + $0x8] sm:$0xff]  }
  0x2d   :  { %v589_v35 = vld [vmem:[#allocation6] sm:$0xff]  }
  0x2e   :  { %v444_v36 = vld [vmem:[%s759_s4] ss:$0 sm:$0xff] }
  0x2f   :  { %503 = vmatpush3.bf16.msra.mxu0 %v567_v3  ;;  %523 = vmatpush3.bf16.msra.mxu1 %v576_v8  ;;  %v453_v47 = vld [vmem:[%s761_s6] ss:$0 sm:$0xff] }
  0x30   :  { %504 = vmatprep.subr.bf16.mxu0 %v659_v0  ;;  %524 = vmatprep.subr.bf16.mxu1 %v659_v0 }
  0x33   :  { %505 = vmatpush3.bf16.msra.mxu0 %v568_v5  ;;  %525 = vmatpush3.bf16.msra.mxu1 %v577_v10 }
  0x34   :  { %506 = vmatprep.subr.bf16.mxu0 %v659_v0  ;;  %526 = vmatprep.subr.bf16.mxu1 %v659_v0 }
  0x37   :  { %507 = vmatpush3.bf16.msra.mxu0 %v569_v7  ;;  %527 = vmatpush3.bf16.msra.mxu1 %v578_v12 }
  0x38   :  { %508 = vmatprep.subr.bf16.mxu0 %v659_v0  ;;  %528 = vmatprep.subr.bf16.mxu1 %v659_v0 }
  0x3b   :  { %509 = vmatpush3.bf16.msra.mxu0 %v570_v9  ;;  %529 = vmatpush3.bf16.msra.mxu1 %v579_v15 }
  0x3c   :  { %510 = vmatprep.subr.bf16.mxu0 %v659_v0  ;;  %530 = vmatprep.subr.bf16.mxu1 %v659_v0 }
  0x3f   :  { %511 = vmatpush3.bf16.msra.mxu0 %v571_v11  ;;  %531 = vmatpush3.bf16.msra.mxu1 %v580_v16 }
  0x40   :  { %512 = vmatprep.subr.bf16.mxu0 %v659_v0  ;;  %532 = vmatprep.subr.bf16.mxu1 %v659_v0 }
  0x43   :  { %513 = vmatpush3.bf16.msra.mxu0 %v572_v13  ;;  %533 = vmatpush3.bf16.msra.mxu1 %v581_v17 }
  0x44   :  { %538 = vmatprep.subr.bf16.mxu0 %v659_v0 }
  0x46   :  { %515 = vmatmul.mubr.bf16.vlgmr.msra.gmra.mxu0 %v573_v14 }
  0x47   :  { %554 = vmatprep.mubr.msk.bf16.mxu0 %vm660_vm0, %v659_v0  ;;  %539 = vmatpush3.bf16.msra.mxu0 %v582_v18 }
  0x48   :  { %540 = vmatprep.subr.bf16.mxu0 %v659_v0 }
  0x4b   :  { %541 = vmatpush3.bf16.msra.mxu0 %v583_v19 }
  0x4c   :  { %542 = vmatprep.subr.bf16.mxu0 %v659_v0 }
  0x4f   :  { %543 = vmatpush3.bf16.msra.mxu0 %v584_v20 }
  0x50   :  { %544 = vmatprep.subr.bf16.mxu0 %v659_v0 }
  0x53   :  { %545 = vmatpush3.bf16.msra.mxu0 %v585_v21 }
  0x54   :  { %546 = vmatprep.subr.bf16.mxu0 %v659_v0 }
  0x57   :  { %547 = vmatpush3.bf16.msra.mxu0 %v586_v22 }
  0x58   :  { %548 = vmatprep.subr.bf16.mxu0 %v659_v0 }
  0x5b   :  { %549 = vmatpush3.bf16.msra.mxu0 %v587_v33 }
  0x5c   :  { %550 = vmatprep.subr.bf16.mxu0 %v659_v0 }
  0x5f   :  { %551 = vmatpush3.bf16.msra.mxu0 %v588_v34 }
  0x60   :  { %552 = vmatprep.subr.bf16.mxu0 %v659_v0 }
  0x63   :  { %553 = vmatpush3.bf16.msra.mxu0 %v589_v35 }
 0x106   :  { %v181_v24 = vpop.f32.mrf.mxu0 }
 0x107   :  { %v182_v26 = vadd.f32 %v434_v23, %v181_v24 }
 0x108   :  { %v516_v25 = vpop.f32.mrf.mxu0 }
 0x109   :  { %v188_v30 = vmax.f32 %v182_v26, 0.0 }
 0x10a   :  { %v184_v27 = vpop.f32.mrf.mxu0 }
 0x10b   :  { %v185_v28 = vadd.f32 %v434_v23, %v184_v27 }
 0x10c   :  { %v517_v29 = vpop.f32.mrf.mxu0 }
 0x10d   :  { %v189_v31 = vmax.f32 %v185_v28, 0.0 }
 0x10f   :  { %v190_v32 = vpack.c.bf16 %v189_v31, %v188_v30 }
 0x111   :  { %535 = vmatmul.mubr.bf16.vlgmr.msra.gmra.mxu1 %v190_v32 }
 0x1d1   :  { %v296_v37 = vpop.f32.mrf.mxu1 }
 0x1d2   :  { %v297_v39 = vadd.f32 %v444_v36, %v296_v37 }
 0x1d3   :  { %v536_v38 = vpop.f32.mrf.mxu1 }
 0x1d4   :  { %v303_v43 = vmax.f32 %v297_v39, 0.0 }
 0x1d5   :  { %v299_v40 = vpop.f32.mrf.mxu1 }
 0x1d6   :  { %v300_v41 = vadd.f32 %v444_v36, %v299_v40 }
 0x1d7   :  { %v537_v42 = vpop.f32.mrf.mxu1 }
 0x1d8   :  { %v304_v44 = vmax.f32 %v300_v41, 0.0 }
 0x1da   :  { %v305_v45 = vpack.c.bf16 %v304_v44, %v303_v43 }
 0x1dc   :  { %555 = vmatmul.mubr.bf16.vlgmr.msra.gmra.mxu0 %v305_v45 }
 0x29c   :  { %v411_v46 = vpop.f32.mrf.mxu0 }
 0x29d   :  { %v412_v50 = vadd.f32 %v453_v47, %v411_v46 }
 0x29e   :  { %v556_v48 = vpop.f32.mrf.mxu0 }
 0x2a0   :  { %v414_v49 = vpop.f32.mrf.mxu0 }
 0x2a1   :  { %v415_v51 = vadd.f32 %v453_v47, %v414_v49 }
 0x2a2   :  { %v557_v52 = vpop.f32.mrf.mxu0 }
 0x2a3   :  { %v469_v53 = vpack.c.bf16 %v415_v51, %v412_v50 }
 0x2a5   :  { %470 = vst [vmem:[%s762_s7] sm:$0xff] %v469_v53  }
 0x2a6   :  { %432 = vsyncpa [#allocation3], 1 }
 0x2a7   :  { %433 = vsyncpa [#allocation5], 1 }

</bundles_post_ra>
